<compile_context>
chip_gen: v5e
topology: v5e:2x2
jax: 0.10.0
libtpu: 0.0.40
codegen_flags: <defaults>
</compile_context>

<pallas_src>
import numpy as np
import jax
import jax.numpy as jnp
from jax import lax
from jax.experimental import pallas as pl
from jax.experimental.pallas import tpu as pltpu

VMEM = pltpu.MemorySpace.VMEM
SMEM = pltpu.MemorySpace.SMEM
BF16 = jnp.bfloat16


# ----------------------------------------------------------------------------- helpers
def _pcall(kernel, out_shapes, args, smem_idx=()):
    """Single-invocation pallas_call: whole arrays resident in VMEM (scalars in SMEM)."""
    in_specs = [pl.BlockSpec(memory_space=SMEM if i in smem_idx else VMEM)
                for i in range(len(args))]
    if isinstance(out_shapes, (tuple, list)):
        out_shape = tuple(out_shapes)
        out_specs = tuple(pl.BlockSpec(memory_space=VMEM) for _ in out_shape)
    else:
        out_shape = out_shapes
        out_specs = pl.BlockSpec(memory_space=VMEM)
    return pl.pallas_call(
        kernel, out_shape=out_shape, in_specs=in_specs, out_specs=out_specs,
        compiler_params=pltpu.CompilerParams(vmem_limit_bytes=32 * 1024 * 1024),
    )(*args)


def _cmm(ar, ai, br, bi):
    """Complex matmul on split real/imag 2-D tiles (MXU, f32 accumulation)."""
    dot = lambda x, y: jnp.dot(x, y, preferred_element_type=jnp.float32)
    return dot(ar, br) - dot(ai, bi), dot(ar, bi) + dot(ai, br)


def _sum_all(v):
    """Full reduction of a 2-D tile to a (1, 1) tile (kept rank-2 for TPU layout)."""
    return jnp.sum(jnp.sum(v, axis=1, keepdims=True), axis=0, keepdims=True)


# ----------------------------------------------------------------------------- MRI kernels
def make_a_adjoint_kernel(C, H, W):
    """A^H(ksp) = sum_c conj(maps_c) * IFFT2c(mask * ksp_c); all coils in 2 complex matmuls."""
    def kernel(kr_ref, ki_ref, mr_ref, mi_ref, maskt_ref,
               fir_ref, fii_ref, gir_ref, gii_ref, or_ref, oi_ref):
        mk = maskt_ref[...]
        kr = kr_ref[...] * mk
        ki = ki_ref[...] * mk
        tr, ti = _cmm(fir_ref[...], fii_ref[...], kr, ki)   # block-diag row IDFT (all coils)
        xr, xi = _cmm(tr, ti, gir_ref[...], gii_ref[...])   # col IDFT
        mr, mi = mr_ref[...], mi_ref[...]
        wr = mr * xr + mi * xi                              # conj(maps) * img
        wi = mr * xi - mi * xr
        or_ref[...] = jnp.sum(wr.reshape(C, H, W), axis=0)  # coil sum
        oi_ref[...] = jnp.sum(wi.reshape(C, H, W), axis=0)
    return kernel


def make_cg_kernel(C, H, W, max_iter, eps):
    """Entire CG solve of (A^H A + lam I) z = A^H(ksp) + lam*est fused in one kernel."""
    eps = float(eps)

    def kernel(est_r_ref, est_i_ref, adj_r_ref, adj_i_ref,
               mr_ref, mi_ref, maskt_ref,
               ffr_ref, ffi_ref, gfr_ref, gfi_ref,
               fir_ref, fii_ref, gir_ref, gii_ref,
               lam_ref, xr_ref, xi_ref):
        lam = lam_ref[0]
        mr3 = mr_ref[...].reshape(C, H, W)
        mi3 = mi_ref[...].reshape(C, H, W)
        mk = maskt_ref[...]
        ffr, ffi = ffr_ref[...], ffi_ref[...]
        gfr, gfi = gfr_ref[...], gfi_ref[...]
        fir, fii = fir_ref[...], fii_ref[...]
        gir, gii = gir_ref[...], gii_ref[...]

        def normal_op(xr, xi):
            # (A^H A + lam I) x, coil-batched (coils stacked along sublanes).
            cr = (mr3 * xr - mi3 * xi).reshape(C * H, W)
            ci = (mr3 * xi + mi3 * xr).reshape(C * H, W)
            tr, ti = _cmm(ffr, ffi, cr, ci)          # fwd row DFT (block-diag, all coils)
            sr, si = _cmm(tr, ti, gfr, gfi)          # fwd col DFT
            sr = sr * mk
            si = si * mk
            tr, ti = _cmm(fir, fii, sr, si)          # inv row DFT
            ur, ui = _cmm(tr, ti, gir, gii)          # inv col DFT
            ur3 = ur.reshape(C, H, W)
            ui3 = ui.reshape(C, H, W)
            wr = mr3 * ur3 + mi3 * ui3               # conj(maps) * img
            wi = mr3 * ui3 - mi3 * ur3
            return (jnp.sum(wr, axis=0) + lam * xr,
                    jnp.sum(wi, axis=0) + lam * xi)

        x0r, x0i = est_r_ref[...], est_i_ref[...]
        br = adj_r_ref[...] + lam * x0r              # rhs = A^H(ksp) + lam * est
        bi = adj_i_ref[...] + lam * x0i
        axr, axi = normal_op(x0r, x0i)
        xr, xi = x0r, x0i
        rr, ri = br - axr, bi - axi
        pr, pi = rr, ri
        rsold = _sum_all(rr * rr + ri * ri)                    # (1, 1)
        act = jnp.where(jnp.sqrt(rsold) >= eps, 1.0, 0.0)      # (1, 1) freeze flag
        # TODO(synk): the exact data-dependent `break` of the original conjgrad_single is
        #             emulated with arithmetically frozen iterations (act == 0); divisions
        #             are guarded so converged iterates never produce inf/NaN.
        for _ in range(max_iter):
            apr, api = normal_op(pr, pi)
            pAp = _sum_all(pr * apr + pi * api)
            alpha = rsold / jnp.where(pAp > 0.0, pAp, 1.0)
            a = act * jnp.where(pAp > 0.0, alpha, 0.0)
            xr = xr + a * pr
            xi = xi + a * pi
            rr = rr - a * apr
            ri = ri - a * api
            rsnew = _sum_all(rr * rr + ri * ri)
            beta = rsnew / jnp.where(rsold > 0.0, rsold, 1.0)
            beta = jnp.where(rsold > 0.0, beta, 0.0)
            pr = pr + act * (rr + (beta - 1.0) * pr)   # frozen iterations leave p unchanged
            pi = pi + act * (ri + (beta - 1.0) * pi)
            rsold = rsnew
            act = act * jnp.where(jnp.sqrt(rsnew) >= eps, 1.0, 0.0)
        xr_ref[...] = xr
        xi_ref[...] = xi

    return kernel


# ----------------------------------------------------------------------------- UNet kernels
def _conv3x3_in_lrelu(x3, wmat):
    """3x3 conv (zero pad 1, no bias) + InstanceNorm2d(affine=False) + LeakyReLU(0.2).

    x3: (Cin, H, W) f32 value; wmat: (Cout, 9*Cin) bf16 with columns ordered
    ((dy*3+dx)*Cin + ci).  Returns (Cout, H*W) f32 (lane-dense).
    """
    C, H, W = x3.shape
    # in-register zero padding (no HBM traffic)
    zc = jnp.zeros((C, H, 1), jnp.float32)
    xp = jnp.concatenate([zc, x3, zc], axis=2)
    zr = jnp.zeros((C, 1, W + 2), jnp.float32)
    xp = jnp.concatenate([zr, xp, zr], axis=1)               # (C, H+2, W+2)
    # in-kernel im2col (tap-major rows) -> one MXU matmul per conv
    cols = jnp.concatenate(
        [xp[:, dy:dy + H, dx:dx + W].reshape(C, H * W)
         for dy in range(3) for dx in range(3)], axis=0)     # (9*Cin, H*W)
    y = jnp.dot(wmat, cols.astype(BF16), preferred_element_type=jnp.float32)
    # one-pass InstanceNorm stats (biased var, eps=1e-5)
    n = float(H * W)
    s = jnp.sum(y, axis=1, keepdims=True)
    ss = jnp.sum(y * y, axis=1, keepdims=True)
    mu = s / n
    var = jnp.maximum(ss / n - mu * mu, 0.0)
    yn = (y - mu) * lax.rsqrt(var + 1e-5)
    return jnp.where(yn >= 0, yn, 0.2 * yn)


def make_conv_block_kernel(H, W):
    """ConvBlock = 2x (conv3x3 -> InstanceNorm2d -> LeakyReLU(0.2) -> Dropout(p=0)),
    fully fused; the intermediate activation never leaves VMEM."""
    def kernel(x_ref, w1_ref, w2_ref, o_ref):
        c1 = w1_ref.shape[0]
        a = _conv3x3_in_lrelu(x_ref[...], w1_ref[...])
        a = _conv3x3_in_lrelu(a.reshape(c1, H, W), w2_ref[...])
        o_ref[...] = a
    return kernel


def tconv_in_lrelu_kernel(x_ref, w_ref, o_ref):
    """ConvTranspose2d(k=2, s=2, bias=False) + InstanceNorm2d + LeakyReLU(0.2).
    x: (Cin, H*W) f32, w: (4*Cout, Cin) bf16 (tap-major rows), o: (4*Cout, H*W) f32."""
    y = jnp.dot(w_ref[...], x_ref[...].astype(BF16), preferred_element_type=jnp.float32)
    fourc, hw = y.shape
    cout = fourc // 4
    n = 4.0 * hw
    rs = jnp.sum(y, axis=1, keepdims=True)                           # (4*Cout, 1)
    rss = jnp.sum(y * y, axis=1, keepdims=True)
    s = jnp.sum(rs.reshape(4, cout, 1), axis=0, keepdims=True)       # (1, Cout, 1)
    ss = jnp.sum(rss.reshape(4, cout, 1), axis=0, keepdims=True)
    mu = s / n
    var = jnp.maximum(ss / n - mu * mu, 0.0)
    inv = lax.rsqrt(var + 1e-5)
    yn = (y.reshape(4, cout, hw) - mu) * inv
    o_ref[...] = jnp.where(yn >= 0, yn, 0.2 * yn).reshape(fourc, hw)


def conv1x1_kernel(x_ref, w_ref, b_ref, o_ref):
    o_ref[...] = (jnp.dot(w_ref[...], x_ref[...].astype(BF16),
                          preferred_element_type=jnp.float32) + b_ref[...])


# ----------------------------------------------------------------------------- DFT matrices
def _centered_dft_mats(n):
    k = np.arange(n)
    F = np.exp(-2j * np.pi * np.outer(k, k) / n) / np.sqrt(n)
    Fi = np.exp(2j * np.pi * np.outer(k, k) / n) / np.sqrt(n)
    S = np.zeros((n, n))
    S[np.arange(n), (np.arange(n) + n // 2) % n] = 1.0
    return S @ F @ S, S @ Fi @ S   # centered (fftshift . fft . ifftshift) DFT / IDFT


def make_fft_mats(C, H, W):
    """Row-DFT matrices are block-diagonal kron(I_C, F_H) so a single (C*H, C*H) x (C*H, W)
    matmul transforms all coils at once.  (At clinical coil counts switch to the
    lane-concatenated (H, C*W) layout instead of kron to avoid the C^2 FLOP factor.)"""
    Fh, Fih = _centered_dft_mats(H)
    Fw, Fiw = _centered_dft_mats(W)
    eye = np.eye(C)
    f32 = lambda a: jnp.asarray(np.ascontiguousarray(a), dtype=jnp.float32)
    return dict(ffr=f32(np.kron(eye, Fh.real)), ffi=f32(np.kron(eye, Fh.imag)),
                fir=f32(np.kron(eye, Fih.real)), fii=f32(np.kron(eye, Fih.imag)),
                gfr=f32(Fw.T.real), gfi=f32(Fw.T.imag),
                gir=f32(Fiw.T.real), gii=f32(Fiw.T.imag))


# ----------------------------------------------------------------------------- MRI glue
def a_adjoint_pallas(kr, ki, mr, mi, maskt, mats, C, H, W):
    return _pcall(make_a_adjoint_kernel(C, H, W),
                  (jax.ShapeDtypeStruct((H, W), jnp.float32),
                   jax.ShapeDtypeStruct((H, W), jnp.float32)),
                  (kr, ki, mr, mi, maskt,
                   mats["fir"], mats["fii"], mats["gir"], mats["gii"]))


def cg_solve_pallas(est_r, est_i, adj_r, adj_i, mr, mi, maskt, lam_arr, mats,
                    C, H, W, max_iter, eps):
    args = (est_r, est_i, adj_r, adj_i, mr, mi, maskt,
            mats["ffr"], mats["ffi"], mats["gfr"], mats["gfi"],
            mats["fir"], mats["fii"], mats["gir"], mats["gii"], lam_arr)
    return _pcall(make_cg_kernel(C, H, W, max_iter, eps),
                  (jax.ShapeDtypeStruct((H, W), jnp.float32),
                   jax.ShapeDtypeStruct((H, W), jnp.float32)),
                  args, smem_idx=(len(args) - 1,))


# ----------------------------------------------------------------------------- UNet glue
def conv_block(x, w1, w2):
    cin, h, w_ = x.shape
    c1 = w1.shape[0]
    w1m = jnp.transpose(w1, (0, 2, 3, 1)).reshape(c1, 9 * cin).astype(BF16)
    w2m = jnp.transpose(w2, (0, 2, 3, 1)).reshape(c1, 9 * c1).astype(BF16)
    y = _pcall(make_conv_block_kernel(h, w_),
               jax.ShapeDtypeStruct((c1, h * w_), jnp.float32), (x, w1m, w2m))
    return y.reshape(c1, h, w_)


def avg_pool_2x2(x):
    # 2x2 average pooling as reshape+mean (pure VPU work, done in glue).
    c, h, w = x.shape
    return jnp.mean(x.reshape(c, h // 2, 2, w // 2, 2), axis=(2, 4))


def transpose_conv_block(x, w):
    cin, h, w_ = x.shape
    cout = w.shape[1]
    wp = jnp.transpose(w, (2, 3, 1, 0)).reshape(4 * cout, cin).astype(BF16)   # tap-major rows
    y = _pcall(tconv_in_lrelu_kernel,
               jax.ShapeDtypeStruct((4 * cout, h * w_), jnp.float32),
               (x.reshape(cin, h * w_), wp))
    y = y.reshape(2, 2, cout, h, w_)
    return jnp.transpose(y, (2, 3, 0, 4, 1)).reshape(cout, 2 * h, 2 * w_)


def conv1x1(x, w, b):
    cin, h, w_ = x.shape
    cout = w.shape[0]
    y = _pcall(conv1x1_kernel,
               jax.ShapeDtypeStruct((cout, h * w_), jnp.float32),
               (x.reshape(cin, h * w_), w.reshape(cout, cin).astype(BF16),
                b.reshape(cout, 1)))
    return y.reshape(cout, h, w_)


def unet_apply(params, x):
    stack = []
    out = x
    for (w1, w2) in params["down"]:
        out = conv_block(out, w1, w2)
        stack.append(out)
        out = avg_pool_2x2(out)
    out = conv_block(out, *params["bottleneck"])
    n_up = len(params["up_t"])
    for i in range(n_up):
        skip = stack.pop()
        out = transpose_conv_block(out, params["up_t"][i])
        # TODO(synk): reflect-padding for mismatched odd spatial sizes omitted (sizes are powers of 2 here).
        out = jnp.concatenate([out, skip], axis=0)
        if i < n_up - 1:
            w1, w2 = params["up_c"][i]
            out = conv_block(out, w1, w2)
        else:
            w1, w2, w1x1, b1x1 = params["up_c"][i]
            out = conv_block(out, w1, w2)
            out = conv1x1(out, w1x1, b1x1)
    return out


def norm_unet_apply(params, x):
    # x: (b=1, c=1, H, W, 2)  -- fastMRI NormUnet
    b, c, h, w, _ = x.shape
    xc = jnp.transpose(x, (0, 4, 1, 2, 3)).reshape(b, 2 * c, h, w)      # complex_to_chan_dim
    grouped = xc.reshape(b, 2, c * h * w)
    mean = jnp.mean(grouped, axis=2).reshape(b, 2, 1, 1)
    std = jnp.std(grouped, axis=2, ddof=1).reshape(b, 2, 1, 1)          # unbiased, like torch
    xn = (xc - mean) / std
    # pad(): H, W already multiples of 16 -> identity here.
    out = unet_apply(params, xn[0])[None]
    out = out * std + mean
    out = jnp.transpose(out.reshape(b, 2, c, h, w), (0, 2, 3, 4, 1))    # chan_complex_to_last_dim
    return out


# ----------------------------------------------------------------------------- parameters
def _conv_w(key, cout, cin, k):
    fan_in = cin * k * k
    return jax.random.normal(key, (cout, cin, k, k), jnp.float32) * float(np.sqrt(2.0 / fan_in))


def init_unet_params(key, chans, num_pools, in_chans=2, out_chans=2):
    keys = iter(jax.random.split(key, 64))
    nk = lambda: next(keys)
    params = {"down": [], "up_t": [], "up_c": []}
    params["down"].append((_conv_w(nk(), chans, in_chans, 3), _conv_w(nk(), chans, chans, 3)))
    ch = chans
    for _ in range(num_pools - 1):
        params["down"].append((_conv_w(nk(), 2 * ch, ch, 3), _conv_w(nk(), 2 * ch, 2 * ch, 3)))
        ch *= 2
    params["bottleneck"] = (_conv_w(nk(), 2 * ch, ch, 3), _conv_w(nk(), 2 * ch, 2 * ch, 3))
    for _ in range(num_pools - 1):
        params["up_t"].append(jax.random.normal(nk(), (2 * ch, ch, 2, 2), jnp.float32)
                              * float(np.sqrt(2.0 / (2 * ch * 4))))
        params["up_c"].append((_conv_w(nk(), ch, 2 * ch, 3), _conv_w(nk(), ch, ch, 3)))
        ch //= 2
    params["up_t"].append(jax.random.normal(nk(), (2 * ch, ch, 2, 2), jnp.float32)
                          * float(np.sqrt(2.0 / (2 * ch * 4))))
    params["up_c"].append((_conv_w(nk(), ch, 2 * ch, 3), _conv_w(nk(), ch, ch, 3),
                           _conv_w(nk(), out_chans, ch, 1),
                           jnp.zeros((out_chans,), jnp.float32)))
    return params


# ----------------------------------------------------------------------------- MoDL forward
def modl_clean_forward(ksp, maps, mask, unet_params, l2lam_arr,
                       max_cg_steps, cg_eps, meta_unrolls=1, logging=False):
    # ksp:  (B=1, C, H, W) complex64
    # maps: (B=1, E=1, C, H, W) complex64 (E = # ESPIRiT map sets)
    # mask: (B=1, 1, H, W) float32
    B, C, H, W = ksp.shape
    assert B == 1 and maps.shape[1] == 1, "synthetic port assumes batch=1, single map set"
    ksp0, maps0, mask0 = ksp[0], maps[0, 0], mask[0, 0]
    mats = make_fft_mats(C, H, W)

    # coil-stacked (C*H, W) float32 layouts (coils along sublanes)
    kr = jnp.real(ksp0).reshape(C * H, W)
    ki = jnp.imag(ksp0).reshape(C * H, W)
    mr = jnp.real(maps0).reshape(C * H, W)
    mi = jnp.imag(maps0).reshape(C * H, W)
    maskt = jnp.tile(mask0, (C, 1))

    adj_r, adj_i = a_adjoint_pallas(kr, ki, mr, mi, maskt, mats, C, H, W)   # A_adjoint(ksp, maps, mask)
    est = lax.complex(adj_r, adj_i)[None, None]                             # (B, E, H, W)
    img_logs = []
    for _ in range(meta_unrolls):
        est_ri = jnp.stack([jnp.real(est[:, 0]), jnp.imag(est[:, 0])], axis=-1)  # view_as_real
        net = norm_unet_apply(unet_params, est_ri[None])[0]                      # image_net(...)[0]
        est_r, est_i = net[0, ..., 0], net[0, ..., 1]                            # view_as_complex
        # rhs = A_adjoint(ksp) + l2lam * est and the full CG solve happen inside one kernel.
        xr, xi = cg_solve_pallas(est_r, est_i, adj_r, adj_i, mr, mi, maskt,
                                 l2lam_arr, mats, C, H, W, max_cg_steps, cg_eps)
        est = lax.complex(xr, xi)[None, None]
        if logging:
            img_logs.append(est)
    if logging:
        return est, img_logs
    return est


# ----------------------------------------------------------------------------- main
if __name__ == "__main__":
    B, E, C, H, W = 1, 1, 4, 16, 16
    km_r, km_i, kk_r, kk_i, kmask = jax.random.split(jax.random.PRNGKey(0), 5)

    maps = (jax.random.normal(km_r, (B, E, C, H, W)) +
            1j * jax.random.normal(km_i, (B, E, C, H, W))).astype(jnp.complex64)
    maps = maps / jnp.sqrt(jnp.sum(jnp.abs(maps) ** 2, axis=2, keepdims=True))

    mask = (jax.random.uniform(kmask, (B, 1, H, W)) < 0.4).astype(jnp.float32)
    mask = mask.at[..., W // 2 - 2: W // 2 + 2].set(1.0)   # fully-sampled center lines

    ksp = (jax.random.normal(kk_r, (B, C, H, W)) +
           1j * jax.random.normal(kk_i, (B, C, H, W))).astype(jnp.complex64)
    ksp = ksp * mask

    unet_params = init_unet_params(jax.random.PRNGKey(1), chans=8, num_pools=2)
    l2lam_arr = jnp.full((1,), 0.1, dtype=jnp.float32)      # block2_l2lam

    out = modl_clean_forward(ksp, maps, mask, unet_params, l2lam_arr,
                             max_cg_steps=6, cg_eps=1e-5, meta_unrolls=1)
    out = jax.block_until_ready(out)

    assert out.shape == (B, E, H, W)
    assert out.dtype == jnp.complex64
    assert bool(jnp.all(jnp.isfinite(jnp.real(out)))) and bool(jnp.all(jnp.isfinite(jnp.imag(out))))
    print("KERNEL_OK")
</pallas_src>

<mosaic_0001>
module attributes {stable_mosaic.version = 11 : i64} {
  func.func @kernel(%arg0: memref<64x16xf32, #tpu.memory_space<vmem>>, %arg1: memref<64x16xf32, #tpu.memory_space<vmem>>, %arg2: memref<64x16xf32, #tpu.memory_space<vmem>>, %arg3: memref<64x16xf32, #tpu.memory_space<vmem>>, %arg4: memref<64x16xf32, #tpu.memory_space<vmem>>, %arg5: memref<64x64xf32, #tpu.memory_space<vmem>>, %arg6: memref<64x64xf32, #tpu.memory_space<vmem>>, %arg7: memref<16x16xf32, #tpu.memory_space<vmem>>, %arg8: memref<16x16xf32, #tpu.memory_space<vmem>>, %arg9: memref<16x16xf32, #tpu.memory_space<vmem>>, %arg10: memref<16x16xf32, #tpu.memory_space<vmem>>) attributes {dimension_semantics = [], scalar_prefetch = 0 : i64, scratch_operands = 0 : i64, tpu.core_type = #tpu.core_type<tc>} {
    %c0 = arith.constant 0 : index
    %c0_0 = arith.constant 0 : index
    %0 = vector.load %arg4[%c0, %c0_0] : memref<64x16xf32, #tpu.memory_space<vmem>>, vector<64x16xf32>
    %c0_1 = arith.constant 0 : index
    %c0_2 = arith.constant 0 : index
    %1 = vector.load %arg0[%c0_1, %c0_2] : memref<64x16xf32, #tpu.memory_space<vmem>>, vector<64x16xf32>
    %2 = arith.mulf %1, %0 : vector<64x16xf32>
    %c0_3 = arith.constant 0 : index
    %c0_4 = arith.constant 0 : index
    %3 = vector.load %arg1[%c0_3, %c0_4] : memref<64x16xf32, #tpu.memory_space<vmem>>, vector<64x16xf32>
    %4 = arith.mulf %3, %0 : vector<64x16xf32>
    %c0_5 = arith.constant 0 : index
    %c0_6 = arith.constant 0 : index
    %5 = vector.load %arg5[%c0_5, %c0_6] : memref<64x64xf32, #tpu.memory_space<vmem>>, vector<64x64xf32>
    %c0_7 = arith.constant 0 : index
    %c0_8 = arith.constant 0 : index
    %6 = vector.load %arg6[%c0_7, %c0_8] : memref<64x64xf32, #tpu.memory_space<vmem>>, vector<64x64xf32>
    %cst = arith.constant dense<0.000000e+00> : vector<64x16xf32>
    %7 = tpu.matmul %5, %2, %cst {dimension_numbers = #tpu.dot_dimension_numbers<[1], [0], [0], [1], [0, 0, 1, 1], [], []>} : vector<64x64xf32>, vector<64x16xf32>, vector<64x16xf32> -> vector<64x16xf32>
    %cst_9 = arith.constant dense<0.000000e+00> : vector<64x16xf32>
    %8 = tpu.matmul %6, %4, %cst_9 {dimension_numbers = #tpu.dot_dimension_numbers<[1], [0], [0], [1], [0, 0, 1, 1], [], []>} : vector<64x64xf32>, vector<64x16xf32>, vector<64x16xf32> -> vector<64x16xf32>
    %9 = arith.subf %7, %8 : vector<64x16xf32>
    %cst_10 = arith.constant dense<0.000000e+00> : vector<64x16xf32>
    %10 = tpu.matmul %5, %4, %cst_10 {dimension_numbers = #tpu.dot_dimension_numbers<[1], [0], [0], [1], [0, 0, 1, 1], [], []>} : vector<64x64xf32>, vector<64x16xf32>, vector<64x16xf32> -> vector<64x16xf32>
    %cst_11 = arith.constant dense<0.000000e+00> : vector<64x16xf32>
    %11 = tpu.matmul %6, %2, %cst_11 {dimension_numbers = #tpu.dot_dimension_numbers<[1], [0], [0], [1], [0, 0, 1, 1], [], []>} : vector<64x64xf32>, vector<64x16xf32>, vector<64x16xf32> -> vector<64x16xf32>
    %12 = arith.addf %10, %11 : vector<64x16xf32>
    %c0_12 = arith.constant 0 : index
    %c0_13 = arith.constant 0 : index
    %13 = vector.load %arg7[%c0_12, %c0_13] : memref<16x16xf32, #tpu.memory_space<vmem>>, vector<16x16xf32>
    %c0_14 = arith.constant 0 : index
    %c0_15 = arith.constant 0 : index
    %14 = vector.load %arg8[%c0_14, %c0_15] : memref<16x16xf32, #tpu.memory_space<vmem>>, vector<16x16xf32>
    %cst_16 = arith.constant dense<0.000000e+00> : vector<64x16xf32>
    %15 = tpu.matmul %9, %13, %cst_16 {dimension_numbers = #tpu.dot_dimension_numbers<[1], [0], [0], [1], [0, 0, 1, 1], [], []>} : vector<64x16xf32>, vector<16x16xf32>, vector<64x16xf32> -> vector<64x16xf32>
    %cst_17 = arith.constant dense<0.000000e+00> : vector<64x16xf32>
    %16 = tpu.matmul %12, %14, %cst_17 {dimension_numbers = #tpu.dot_dimension_numbers<[1], [0], [0], [1], [0, 0, 1, 1], [], []>} : vector<64x16xf32>, vector<16x16xf32>, vector<64x16xf32> -> vector<64x16xf32>
    %17 = arith.subf %15, %16 : vector<64x16xf32>
    %cst_18 = arith.constant dense<0.000000e+00> : vector<64x16xf32>
    %18 = tpu.matmul %9, %14, %cst_18 {dimension_numbers = #tpu.dot_dimension_numbers<[1], [0], [0], [1], [0, 0, 1, 1], [], []>} : vector<64x16xf32>, vector<16x16xf32>, vector<64x16xf32> -> vector<64x16xf32>
    %cst_19 = arith.constant dense<0.000000e+00> : vector<64x16xf32>
    %19 = tpu.matmul %12, %13, %cst_19 {dimension_numbers = #tpu.dot_dimension_numbers<[1], [0], [0], [1], [0, 0, 1, 1], [], []>} : vector<64x16xf32>, vector<16x16xf32>, vector<64x16xf32> -> vector<64x16xf32>
    %20 = arith.addf %18, %19 : vector<64x16xf32>
    %c0_20 = arith.constant 0 : index
    %c0_21 = arith.constant 0 : index
    %21 = vector.load %arg2[%c0_20, %c0_21] : memref<64x16xf32, #tpu.memory_space<vmem>>, vector<64x16xf32>
    %c0_22 = arith.constant 0 : index
    %c0_23 = arith.constant 0 : index
    %22 = vector.load %arg3[%c0_22, %c0_23] : memref<64x16xf32, #tpu.memory_space<vmem>>, vector<64x16xf32>
    %23 = arith.mulf %21, %17 : vector<64x16xf32>
    %24 = arith.mulf %22, %20 : vector<64x16xf32>
    %25 = arith.addf %23, %24 : vector<64x16xf32>
    %26 = arith.mulf %21, %20 : vector<64x16xf32>
    %27 = arith.mulf %22, %17 : vector<64x16xf32>
    %28 = arith.subf %26, %27 : vector<64x16xf32>
    %29 = vector.shape_cast %25 : vector<64x16xf32> to vector<4x16x16xf32>
    %cst_24 = arith.constant dense<0.000000e+00> : vector<16x16xf32>
    %30 = vector.multi_reduction <add>, %29, %cst_24 [0] : vector<4x16x16xf32> to vector<16x16xf32>
    %c0_25 = arith.constant 0 : index
    %c0_26 = arith.constant 0 : index
    %31 = vector.load %arg9[%c0_25, %c0_26] : memref<16x16xf32, #tpu.memory_space<vmem>>, vector<16x16xf32>
    tpu.vector_store %arg9[%c0_25, %c0_26], %30 {strides = array<i32>} : memref<16x16xf32, #tpu.memory_space<vmem>>, vector<16x16xf32>,
    %32 = vector.shape_cast %28 : vector<64x16xf32> to vector<4x16x16xf32>
    %cst_27 = arith.constant dense<0.000000e+00> : vector<16x16xf32>
    %33 = vector.multi_reduction <add>, %32, %cst_27 [0] : vector<4x16x16xf32> to vector<16x16xf32>
    %c0_28 = arith.constant 0 : index
    %c0_29 = arith.constant 0 : index
    %34 = vector.load %arg10[%c0_28, %c0_29] : memref<16x16xf32, #tpu.memory_space<vmem>>, vector<16x16xf32>
    tpu.vector_store %arg10[%c0_28, %c0_29], %33 {strides = array<i32>} : memref<16x16xf32, #tpu.memory_space<vmem>>, vector<16x16xf32>,
    return
  }
}

</mosaic_0001>

<bundles_post_ra>
// kernel: tpu_custom_call.1
= control target key start
LH: loop header
LB: loop body
LE: loop exit
PB: predicated region body
PF: predicated region fallthrough
CT: control target
= control target key end

     0   :  { %16 = vsyncpa [#allocation3], 0  ;;  %s1122_s0 = inlined_call_operand.vmem [shape: f32[64,16], index: 0, kind: input, shape index: {}]   ;;  %s1123_s1 = inlined_call_operand.vmem [shape: f32[64,16], index: 1, kind: input, shape index: {}]   ;;  %s1124_s2 = inlined_call_operand.vmem [shape: f32[64,16], index: 2, kind: input, shape index: {}]   ;;  %s1125_s3 = inlined_call_operand.vmem [shape: f32[64,16], index: 3, kind: input, shape index: {}]   ;;  %s1126_s4 = inlined_call_operand.vmem [shape: f32[64,16], index: 4, kind: input, shape index: {}]   ;;  %s1127_s5 = inlined_call_operand.vmem [shape: f32[64,64], index: 5, kind: input, shape index: {}]   ;;  %s1128_s6 = inlined_call_operand.vmem [shape: f32[64,64], index: 6, kind: input, shape index: {}]   ;;  %s1129_s7 = inlined_call_operand.vmem [shape: f32[16,16], index: 7, kind: input, shape index: {}]   ;;  %s1130_s8 = inlined_call_operand.vmem [shape: f32[16,16], index: 8, kind: input, shape index: {}]   ;;  %s1131_s9 = inlined_call_operand.hbm [shape: f32[16,16], index: 9, kind: output, shape index: {0}]   ;;  %s1132_s10 = inlined_call_operand.hbm [shape: f32[16,16], index: 10, kind: output, shape index: {1}]  }
   0x1   :  { %v43_v0 = vld [vmem:[%s1126_s4 + $0x38] sm:$0xff]  ;;  %v42_v5 = vld [vmem:[%s1126_s4 + $0x30] sm:$0xff]  ;;  %v41_v10 = vld [vmem:[%s1126_s4 + $0x28] sm:$0xff] }
   0x2   :  { %v51_v1 = vld [vmem:[%s1122_s0 + $0x38] sm:$0xff]  ;;  %v50_v6 = vld [vmem:[%s1122_s0 + $0x30] sm:$0xff]  ;;  %v49_v11 = vld [vmem:[%s1122_s0 + $0x28] sm:$0xff] }
   0x3   :  { %v67_v2 = vld [vmem:[%s1123_s1 + $0x38] sm:$0xff]  ;;  %v59_v3 = vmul.f32 %v51_v1, %v43_v0  ;;  %v66_v7 = vld [vmem:[%s1123_s1 + $0x30] sm:$0xff]  ;;  %v58_v8 = vmul.f32 %v50_v6, %v42_v5  ;;  %v65_v12 = vld [vmem:[%s1123_s1 + $0x28] sm:$0xff]  ;;  %v57_v13 = vmul.f32 %v49_v11, %v41_v10 }
   0x4   :  { %v75_v4 = vmul.f32 %v67_v2, %v43_v0  ;;  %v74_v9 = vmul.f32 %v66_v7, %v42_v5  ;;  %v73_v14 = vmul.f32 %v65_v12, %v41_v10  ;;  %v40_v15 = vld [vmem:[%s1126_s4 + $0x20] sm:$0xff]  ;;  %v39_v18 = vld [vmem:[%s1126_s4 + $0x18] sm:$0xff]  ;;  %v38_v23 = vld [vmem:[%s1126_s4 + $0x10] sm:$0xff] }
   0x5   :  { %239 = vmatpush.msra.mxu2 %v59_v3  ;;  %v48_v16 = vld [vmem:[%s1122_s0 + $0x20] sm:$0xff]  ;;  %125 = vmatpush.msra.mxu0 %v59_v3  ;;  %v47_v19 = vld [vmem:[%s1122_s0 + $0x18] sm:$0xff]  ;;  %v46_v24 = vld [vmem:[%s1122_s0 + $0x10] sm:$0xff] }
   0x6   :  { %280 = vmatpush.msra.mxu3 %v75_v4  ;;  %v64_v17 = vld [vmem:[%s1123_s1 + $0x20] sm:$0xff]  ;;  %190 = vmatpush.msra.mxu1 %v75_v4  ;;  %v63_v20 = vld [vmem:[%s1123_s1 + $0x18] sm:$0xff]  ;;  %v56_v21 = vmul.f32 %v48_v16, %v40_v15  ;;  %v62_v25 = vld [vmem:[%s1123_s1 + $0x10] sm:$0xff]  ;;  %v55_v26 = vmul.f32 %v47_v19, %v39_v18  ;;  %v54_v31 = vmul.f32 %v46_v24, %v38_v23 }
   0x7   :  { %240 = vmatpush.msra.mxu2 %v58_v8  ;;  %v72_v22 = vmul.f32 %v64_v17, %v40_v15  ;;  %126 = vmatpush.msra.mxu0 %v58_v8  ;;  %v71_v27 = vmul.f32 %v63_v20, %v39_v18  ;;  %v37_v28 = vld [vmem:[%s1126_s4 + $0x8] sm:$0xff]  ;;  %v70_v32 = vmul.f32 %v62_v25, %v38_v23  ;;  %v36_v33 = vld [vmem:[%s1126_s4] sm:$0xff] }
   0x8   :  { %281 = vmatpush.msra.mxu3 %v74_v9  ;;  %191 = vmatpush.msra.mxu1 %v74_v9  ;;  %v45_v29 = vld [vmem:[%s1122_s0 + $0x8] sm:$0xff]  ;;  %v44_v34 = vld [vmem:[%s1122_s0] sm:$0xff] }
   0x9   :  { %241 = vmatpush.msra.mxu2 %v57_v13  ;;  %127 = vmatpush.msra.mxu0 %v57_v13  ;;  %v61_v30 = vld [vmem:[%s1123_s1 + $0x8] sm:$0xff]  ;;  %v60_v35 = vld [vmem:[%s1123_s1] sm:$0xff] }
   0xa   :  { %282 = vmatpush.msra.mxu3 %v73_v14  ;;  %192 = vmatpush.msra.mxu1 %v73_v14 }
   0xb   :  { %242 = vmatpush.msra.mxu2 %v56_v21  ;;  %128 = vmatpush.msra.mxu0 %v56_v21 }
   0xc   :  { %283 = vmatpush.msra.mxu3 %v72_v22  ;;  %193 = vmatpush.msra.mxu1 %v72_v22 }
   0xd   :  { %17 = vsyncpa [#allocation5], 0  ;;  %243 = vmatpush.msra.mxu2 %v55_v26  ;;  %v53_v36 = vmul.f32 %v45_v29, %v37_v28  ;;  %v69_v37 = vmul.f32 %v61_v30, %v37_v28  ;;  %129 = vmatpush.msra.mxu0 %v55_v26  ;;  %v52_v38 = vmul.f32 %v44_v34, %v36_v33  ;;  %v84_v40 = vld [vmem:[%s1128_s6] sm:$0xff]  ;;  %vm92_vm0 = vcmask 523264   ;;  %v85_v42 = vld [vmem:[%s1128_s6 + $0x8] sm:$0xff]  ;;  %s653_s18 = sshll.u32 %s1132_s10, 4  ;;  %s654_s18 = int_to_ptr.hbm [resolvable:$true] %s653_s18 }
   0xe   :  { %284 = vmatpush.msra.mxu3 %v71_v27  ;;  %194 = vmatpush.msra.mxu1 %v71_v27  ;;  %v68_v39 = vmul.f32 %v60_v35, %v36_v33  ;;  %v76_v41 = vld [vmem:[%s1127_s5] sm:$0xff]  ;;  %v77_v43 = vld [vmem:[%s1127_s5 + $0x8] sm:$0xff]  ;;  %v86_v44 = vld [vmem:[%s1128_s6 + $0x10] sm:$0xff]  ;;  %vm317_vm1 = vcmask 130048   ;;  %s791_s19 = smov [#allocation2]   ;;  %s640_s1 = sshll.u32 %s1131_s9, 4  ;;  %s641_s1 = int_to_ptr.hbm [resolvable:$true] %s640_s1 }
   0xf   :  { %244 = vmatpush.msra.mxu2 %v54_v31  ;;  %130 = vmatpush.msra.mxu0 %v54_v31  ;;  %v78_v45 = vld [vmem:[%s1127_s5 + $0x10] sm:$0xff]  ;;  %v87_v46 = vld [vmem:[%s1128_s6 + $0x18] sm:$0xff]  ;;  %v314_v48 = vld [vmem:[%s1129_s7 + $0x8] sm:$0xff]  ;;  %s638_s20 = sshll.u32 %s791_s19, 4  ;;  %s792_s10 = smov 128   ;;  %s639_s20 = int_to_ptr.vmem [resolvable:$true] %s638_s20 }
  0x10   :  { %285 = vmatpush.msra.mxu3 %v70_v32  ;;  %195 = vmatpush.msra.mxu1 %v70_v32  ;;  %v79_v47 = vld [vmem:[%s1127_s5 + $0x18] sm:$0xff]  ;;  %v316_v49 = vld [vmem:[%s1130_s8 + $0x8] sm:$0xff]  ;;  %v313_v50 = vld [vmem:[%s1129_s7] sm:$0xff]  ;;  %s793_s21 = smov 8  }
  0x11   :  { %245 = vmatpush.msra.mxu2 %v53_v36  ;;  %131 = vmatpush.msra.mxu0 %v53_v36  ;;  %v315_v51 = vld [vmem:[%s1130_s8] sm:$0xff]  ;;  %v89_v54 = vld [vmem:[%s1128_s6 + $0x28] sm:$0xff]  ;;  %v90_v56 = vld [vmem:[%s1128_s6 + $0x30] sm:$0xff] }
  0x12   :  { %286 = vmatpush.msra.mxu3 %v69_v37  ;;  %196 = vmatpush.msra.mxu1 %v69_v37  ;;  %v88_v52 = vld [vmem:[%s1128_s6 + $0x20] sm:$0xff]  ;;  %v81_v55 = vld [vmem:[%s1127_s5 + $0x28] sm:$0xff]  ;;  %v82_v57 = vld [vmem:[%s1127_s5 + $0x30] sm:$0xff] }
  0x13   :  { %246 = vmatpush.msra.mxu2 %v52_v38  ;;  %132 = vmatpush.msra.mxu0 %v52_v38  ;;  %v80_v53 = vld [vmem:[%s1127_s5 + $0x20] sm:$0xff]  ;;  %v91_v58 = vld [vmem:[%s1128_s6 + $0x38] sm:$0xff] }
  0x14   :  { %287 = vmatpush.msra.mxu3 %v68_v39  ;;  %686 = vmatmul.msk.f32.vlgmr.msra.gmra.mxu2 %vm92_vm0, %v84_v40  ;;  %v83_v59 = vld [vmem:[%s1127_s5 + $0x38] sm:$0xff] }
  0x15   :  { %694 = vmatmul.msk.f32.vlgmr.msra.gmra.mxu3 %vm92_vm0, %v76_v41  ;;  %197 = vmatpush.msra.mxu1 %v68_v39 }
  0x16   :  { %670 = vmatmul.msk.f32.vlgmr.msra.gmra.mxu0 %vm92_vm0, %v76_v41  ;;  %678 = vmatmul.msk.f32.vlgmr.msra.gmra.mxu1 %vm92_vm0, %v84_v40 }
  0x17   :  { %470 = vmatpush.msrb.mxu2 %v314_v48  ;;  %511 = vmatpush.msrb.mxu3 %v316_v49 }
  0x18   :  { %356 = vmatpush.msrb.mxu0 %v314_v48  ;;  %421 = vmatpush.msrb.mxu1 %v316_v49 }
  0x19   :  { %471 = vmatpush.msrb.mxu2 %v313_v50  ;;  %512 = vmatpush.msrb.mxu3 %v315_v51 }
  0x1a   :  { %357 = vmatpush.msrb.mxu0 %v313_v50  ;;  %422 = vmatpush.msrb.mxu1 %v315_v51 }
  0x1c   :  { %687 = vmatmul.msk.f32.gmra.mxu2 %vm92_vm0, %v85_v42 }
  0x1d   :  { %695 = vmatmul.msk.f32.gmra.mxu3 %vm92_vm0, %v77_v43 }
  0x1e   :  { %671 = vmatmul.msk.f32.gmra.mxu0 %vm92_vm0, %v77_v43  ;;  %679 = vmatmul.msk.f32.gmra.mxu1 %vm92_vm0, %v85_v42 }
  0x24   :  { %688 = vmatmul.msk.f32.gmra.mxu2 %vm92_vm0, %v86_v44 }
  0x25   :  { %696 = vmatmul.msk.f32.gmra.mxu3 %vm92_vm0, %v78_v45 }
  0x26   :  { %672 = vmatmul.msk.f32.gmra.mxu0 %vm92_vm0, %v78_v45  ;;  %680 = vmatmul.msk.f32.gmra.mxu1 %vm92_vm0, %v86_v44 }
  0x2c   :  { %689 = vmatmul.msk.f32.gmra.mxu2 %vm92_vm0, %v87_v46 }
  0x2d   :  { %697 = vmatmul.msk.f32.gmra.mxu3 %vm92_vm0, %v79_v47 }
  0x2e   :  { %673 = vmatmul.msk.f32.gmra.mxu0 %vm92_vm0, %v79_v47  ;;  %681 = vmatmul.msk.f32.gmra.mxu1 %vm92_vm0, %v87_v46 }
  0x34   :  { %690 = vmatmul.msk.f32.gmra.mxu2 %vm92_vm0, %v88_v52 }
  0x35   :  { %698 = vmatmul.msk.f32.gmra.mxu3 %vm92_vm0, %v80_v53 }
  0x36   :  { %674 = vmatmul.msk.f32.gmra.mxu0 %vm92_vm0, %v80_v53  ;;  %682 = vmatmul.msk.f32.gmra.mxu1 %vm92_vm0, %v88_v52 }
  0x3c   :  { %691 = vmatmul.msk.f32.gmra.mxu2 %vm92_vm0, %v89_v54 }
  0x3d   :  { %699 = vmatmul.msk.f32.gmra.mxu3 %vm92_vm0, %v81_v55 }
  0x3e   :  { %675 = vmatmul.msk.f32.gmra.mxu0 %vm92_vm0, %v81_v55  ;;  %683 = vmatmul.msk.f32.gmra.mxu1 %vm92_vm0, %v89_v54 }
  0x44   :  { %692 = vmatmul.msk.f32.gmra.mxu2 %vm92_vm0, %v90_v56 }
  0x45   :  { %700 = vmatmul.msk.f32.gmra.mxu3 %vm92_vm0, %v82_v57 }
  0x46   :  { %676 = vmatmul.msk.f32.gmra.mxu0 %vm92_vm0, %v82_v57  ;;  %684 = vmatmul.msk.f32.gmra.mxu1 %vm92_vm0, %v90_v56 }
  0x4c   :  { %693 = vmatmul.msk.f32.gmra.mxu2 %vm92_vm0, %v91_v58 }
  0x4d   :  { %701 = vmatmul.msk.f32.gmra.mxu3 %vm92_vm0, %v83_v59 }
  0x4e   :  { %677 = vmatmul.msk.f32.gmra.mxu0 %vm92_vm0, %v83_v59  ;;  %685 = vmatmul.msk.f32.gmra.mxu1 %vm92_vm0, %v91_v58 }
  0x93   :  { %v134_v60 = vpop.f32.mrf.mxu0  ;;  %v199_v61 = vpop.f32.mrf.mxu1 }
  0x94   :  { %v223_v62 = vsub.f32 %v134_v60, %v199_v61 }
  0x96   :  { %702 = vmatmul.msk.f32.vlgmr.msrb.gmra.mxu0 %vm317_vm1, %v223_v62  ;;  %726 = vmatmul.msk.f32.vlgmr.msrb.gmra.mxu3 %vm317_vm1, %v223_v62 }
  0x97   :  { %v248_v63 = vpop.f32.mrf.mxu2 }
  0x98   :  { %v289_v0 = vpop.f32.mrf.mxu3 }
  0x99   :  { %v290_v1 = vadd.f32 %v289_v0, %v248_v63 }
  0x9b   :  { %710 = vmatmul.msk.f32.vlgmr.msrb.gmra.mxu1 %vm317_vm1, %v290_v1  ;;  %718 = vmatmul.msk.f32.vlgmr.msrb.gmra.mxu2 %vm317_vm1, %v290_v1  ;;  %v137_v2 = vpop.f32.mrf.mxu0  ;;  %v202_v3 = vpop.f32.mrf.mxu1 }
  0x9c   :  { %v224_v4 = vsub.f32 %v137_v2, %v202_v3 }
  0x9e   :  { %703 = vmatmul.msk.f32.gmra.mxu0 %vm317_vm1, %v224_v4  ;;  %727 = vmatmul.msk.f32.gmra.mxu3 %vm317_vm1, %v224_v4 }
  0x9f   :  { %v251_v5 = vpop.f32.mrf.mxu2 }
  0xa0   :  { %v292_v6 = vpop.f32.mrf.mxu3 }
  0xa1   :  { %v293_v7 = vadd.f32 %v292_v6, %v251_v5  ;;  %v538_v6 = vld [vmem:[%s1124_s2] sm:$0xff] }
  0xa3   :  { %711 = vmatmul.msk.f32.gmra.mxu1 %vm317_vm1, %v293_v7  ;;  %719 = vmatmul.msk.f32.gmra.mxu2 %vm317_vm1, %v293_v7  ;;  %v140_v8 = vpop.f32.mrf.mxu0  ;;  %v205_v9 = vpop.f32.mrf.mxu1  ;;  %v546_v7 = vld [vmem:[%s1125_s3] sm:$0xff] }
  0xa4   :  { %v225_v10 = vsub.f32 %v140_v8, %v205_v9 }
  0xa6   :  { %704 = vmatmul.msk.f32.gmra.mxu0 %vm317_vm1, %v225_v10  ;;  %728 = vmatmul.msk.f32.gmra.mxu3 %vm317_vm1, %v225_v10 }
  0xa7   :  { %v254_v11 = vpop.f32.mrf.mxu2 }
  0xa8   :  { %v295_v12 = vpop.f32.mrf.mxu3 }
  0xa9   :  { %v296_v13 = vadd.f32 %v295_v12, %v254_v11 }
  0xab   :  { %712 = vmatmul.msk.f32.gmra.mxu1 %vm317_vm1, %v296_v13  ;;  %720 = vmatmul.msk.f32.gmra.mxu2 %vm317_vm1, %v296_v13  ;;  %v143_v14 = vpop.f32.mrf.mxu0  ;;  %v208_v15 = vpop.f32.mrf.mxu1  ;;  %v540_v13 = vld [vmem:[%s1124_s2 + $0x10] sm:$0xff] }
  0xac   :  { %v226_v16 = vsub.f32 %v143_v14, %v208_v15  ;;  %v548_v14 = vld [vmem:[%s1125_s3 + $0x10] sm:$0xff] }
  0xae   :  { %705 = vmatmul.msk.f32.gmra.mxu0 %vm317_vm1, %v226_v16  ;;  %729 = vmatmul.msk.f32.gmra.mxu3 %vm317_vm1, %v226_v16 }
  0xaf   :  { %v257_v17 = vpop.f32.mrf.mxu2 }
  0xb0   :  { %v298_v18 = vpop.f32.mrf.mxu3 }
  0xb1   :  { %v299_v19 = vadd.f32 %v298_v18, %v257_v17 }
  0xb3   :  { %713 = vmatmul.msk.f32.gmra.mxu1 %vm317_vm1, %v299_v19  ;;  %721 = vmatmul.msk.f32.gmra.mxu2 %vm317_vm1, %v299_v19  ;;  %v146_v20 = vpop.f32.mrf.mxu0  ;;  %v211_v21 = vpop.f32.mrf.mxu1 }
  0xb4   :  { %v227_v22 = vsub.f32 %v146_v20, %v211_v21 }
  0xb6   :  { %706 = vmatmul.msk.f32.gmra.mxu0 %vm317_vm1, %v227_v22  ;;  %730 = vmatmul.msk.f32.gmra.mxu3 %vm317_vm1, %v227_v22  ;;  %v542_v22 = vld [vmem:[%s1124_s2 + $0x20] sm:$0xff] }
  0xb7   :  { %v260_v23 = vpop.f32.mrf.mxu2 }
  0xb8   :  { %v301_v24 = vpop.f32.mrf.mxu3 }
  0xb9   :  { %v302_v25 = vadd.f32 %v301_v24, %v260_v23  ;;  %v550_v23 = vld [vmem:[%s1125_s3 + $0x20] sm:$0xff] }
  0xbb   :  { %714 = vmatmul.msk.f32.gmra.mxu1 %vm317_vm1, %v302_v25  ;;  %722 = vmatmul.msk.f32.gmra.mxu2 %vm317_vm1, %v302_v25  ;;  %v149_v26 = vpop.f32.mrf.mxu0  ;;  %v214_v27 = vpop.f32.mrf.mxu1  ;;  %v539_v25 = vld [vmem:[%s1124_s2 + $0x8] sm:$0xff] }
  0xbc   :  { %v228_v28 = vsub.f32 %v149_v26, %v214_v27  ;;  %v547_v26 = vld [vmem:[%s1125_s3 + $0x8] sm:$0xff] }
  0xbe   :  { %707 = vmatmul.msk.f32.gmra.mxu0 %vm317_vm1, %v228_v28  ;;  %731 = vmatmul.msk.f32.gmra.mxu3 %vm317_vm1, %v228_v28 }
  0xbf   :  { %v263_v29 = vpop.f32.mrf.mxu2 }
  0xc0   :  { %v304_v30 = vpop.f32.mrf.mxu3 }
  0xc1   :  { %v305_v31 = vadd.f32 %v304_v30, %v263_v29 }
  0xc3   :  { %715 = vmatmul.msk.f32.gmra.mxu1 %vm317_vm1, %v305_v31  ;;  %723 = vmatmul.msk.f32.gmra.mxu2 %vm317_vm1, %v305_v31  ;;  %v152_v32 = vpop.f32.mrf.mxu0  ;;  %v217_v33 = vpop.f32.mrf.mxu1 }
  0xc4   :  { %v229_v34 = vsub.f32 %v152_v32, %v217_v33 }
  0xc6   :  { %708 = vmatmul.msk.f32.gmra.mxu0 %vm317_vm1, %v229_v34  ;;  %732 = vmatmul.msk.f32.gmra.mxu3 %vm317_vm1, %v229_v34 }
  0xc7   :  { %v266_v35 = vpop.f32.mrf.mxu2 }
  0xc8   :  { %v307_v36 = vpop.f32.mrf.mxu3 }
  0xc9   :  { %v308_v37 = vadd.f32 %v307_v36, %v266_v35 }
  0xcb   :  { %716 = vmatmul.msk.f32.gmra.mxu1 %vm317_vm1, %v308_v37  ;;  %724 = vmatmul.msk.f32.gmra.mxu2 %vm317_vm1, %v308_v37  ;;  %v155_v38 = vpop.f32.mrf.mxu0  ;;  %v220_v39 = vpop.f32.mrf.mxu1 }
  0xcc   :  { %v230_v40 = vsub.f32 %v155_v38, %v220_v39 }
  0xce   :  { %709 = vmatmul.msk.f32.gmra.mxu0 %vm317_vm1, %v230_v40  ;;  %733 = vmatmul.msk.f32.gmra.mxu3 %vm317_vm1, %v230_v40 }
  0xcf   :  { %v269_v41 = vpop.f32.mrf.mxu2 }
  0xd0   :  { %v310_v42 = vpop.f32.mrf.mxu3 }
  0xd1   :  { %v311_v43 = vadd.f32 %v310_v42, %v269_v41 }
  0xd3   :  { %717 = vmatmul.msk.f32.gmra.mxu1 %vm317_vm1, %v311_v43  ;;  %725 = vmatmul.msk.f32.gmra.mxu2 %vm317_vm1, %v311_v43 }
 0x113   :  { %v359_v44 = vpop.f32.mrf.mxu0 }
 0x118   :  { %v424_v45 = vpop.f32.mrf.mxu1 }
 0x119   :  { %v514_v46 = vpop.f32.mrf.mxu3  ;;  %v448_v3 = vsub.f32 %v359_v44, %v424_v45  ;;  %v541_v44 = vld [vmem:[%s1124_s2 + $0x18] sm:$0xff] }
 0x11a   :  { %v549_v45 = vld [vmem:[%s1125_s3 + $0x18] sm:$0xff] }
 0x11b   :  { %v362_v47 = vpop.f32.mrf.mxu0  ;;  %v554_v15 = vmul.f32 %v538_v6, %v448_v3  ;;  %v586_v19 = vmul.f32 %v546_v7, %v448_v3  ;;  %v543_v3 = vld [vmem:[%s1124_s2 + $0x28] sm:$0xff] }
 0x11e   :  { %v473_v48 = vpop.f32.mrf.mxu2 }
 0x11f   :  { %v515_v1 = vadd.f32 %v514_v46, %v473_v48 }
 0x120   :  { %v427_v49 = vpop.f32.mrf.mxu1 }
 0x121   :  { %v517_v50 = vpop.f32.mrf.mxu3  ;;  %v562_v8 = vmul.f32 %v546_v7, %v515_v1  ;;  %v578_v11 = vmul.f32 %v538_v6, %v515_v1  ;;  %v449_v20 = vsub.f32 %v362_v47, %v427_v49 }
 0x123   :  { %v365_v51 = vpop.f32.mrf.mxu0  ;;  %v570_v24 = vadd.f32 %v562_v8, %v554_v15  ;;  %v594_v32 = vsub.f32 %v578_v11, %v586_v19  ;;  %v555_v41 = vmul.f32 %v539_v25, %v449_v20  ;;  %v587_v42 = vmul.f32 %v547_v26, %v449_v20 }
 0x125   :  { %v602_v47 = vsel %vm317_vm1, %v570_v24, 0.0 }
 0x126   :  { %v476_v52 = vpop.f32.mrf.mxu2 }
 0x127   :  { %v518_v12 = vadd.f32 %v517_v50, %v476_v52 }
 0x128   :  { %v430_v53 = vpop.f32.mrf.mxu1 }
 0x129   :  { %v520_v54 = vpop.f32.mrf.mxu3  ;;  %v450_v9 = vsub.f32 %v365_v51, %v430_v53  ;;  %v563_v33 = vmul.f32 %v547_v26, %v518_v12  ;;  %v1069_v34 = vmul.f32 %v539_v25, %v518_v12  ;;  %v618_v51 = vsel %vm317_vm1, %v594_v32, 0.0  ;;  %v545_v32 = vld [vmem:[%s1124_s2 + $0x38] sm:$0xff] }
 0x12b   :  { %v368_v55 = vpop.f32.mrf.mxu0  ;;  %v556_v27 = vmul.f32 %v540_v13, %v450_v9  ;;  %v588_v35 = vmul.f32 %v548_v14, %v450_v9  ;;  %v571_v52 = vadd.f32 %v563_v33, %v555_v41  ;;  %v595_v53 = vsub.f32 %v1069_v34, %v587_v42  ;;  %v553_v33 = vld [vmem:[%s1125_s3 + $0x38] sm:$0xff] }
 0x12e   :  { %v479_v56 = vpop.f32.mrf.mxu2 }
 0x12f   :  { %v521_v4 = vadd.f32 %v520_v54, %v479_v56 }
 0x130   :  { %v433_v57 = vpop.f32.mrf.mxu1 }
 0x131   :  { %v523_v58 = vpop.f32.mrf.mxu3  ;;  %v564_v16 = vmul.f32 %v548_v14, %v521_v4  ;;  %v580_v21 = vmul.f32 %v540_v13, %v521_v4  ;;  %v451_v37 = vsub.f32 %v368_v55, %v433_v57 }
 0x133   :  { %v371_v59 = vpop.f32.mrf.mxu0  ;;  %v572_v36 = vadd.f32 %v564_v16, %v556_v27  ;;  %v596_v43 = vsub.f32 %v580_v21, %v588_v35  ;;  %v557_v56 = vmul.f32 %v541_v44, %v451_v37  ;;  %v589_v57 = vmul.f32 %v549_v45, %v451_v37 }
 0x135   :  { %v603_v55 = vsel %vm317_vm1, %v572_v36, 0.0 }
 0x136   :  { %v482_v60 = vpop.f32.mrf.mxu2  ;;  %v604_v12 = vadd.f32 %v603_v55, %v602_v47 }
 0x137   :  { %v524_v46 = vadd.f32 %v523_v58, %v482_v60  ;;  %v544_v58 = vld [vmem:[%s1124_s2 + $0x30] sm:$0xff]  ;;  %s790_s2 = smov [#allocation4]  }
 0x138   :  { %v436_v61 = vpop.f32.mrf.mxu1  ;;  %v552_v60 = vld [vmem:[%s1125_s3 + $0x30] sm:$0xff] }
 0x139   :  { %v526_v62 = vpop.f32.mrf.mxu3  ;;  %v452_v17 = vsub.f32 %v371_v59, %v436_v61  ;;  %v581_v1 = vmul.f32 %v541_v44, %v524_v46 }
 0x13b   :  { %v374_v0 = vpop.f32.mrf.mxu0  ;;  %v558_v38 = vmul.f32 %v542_v22, %v452_v17  ;;  %v590_v39 = vmul.f32 %v550_v23, %v452_v17  ;;  %v597_v19 = vsub.f32 %v581_v1, %v589_v57 }
 0x13d   :  { %v626_v36 = vsel %vm317_vm1, %v597_v19, 0.0 }
 0x13e   :  { %v485_v63 = vpop.f32.mrf.mxu2 }
 0x13f   :  { %v527_v10 = vadd.f32 %v526_v62, %v485_v63  ;;  %v619_v62 = vsel %vm317_vm1, %v596_v43, 0.0  ;;  %v565_v63 = vmul.f32 %v549_v45, %v524_v46 }
 0x140   :  { %v439_v2 = vpop.f32.mrf.mxu1  ;;  %v620_v13 = vadd.f32 %v619_v62, %v618_v51 }
 0x141   :  { %v529_v5 = vpop.f32.mrf.mxu3  ;;  %v566_v28 = vmul.f32 %v550_v23, %v527_v10  ;;  %v582_v29 = vmul.f32 %v542_v22, %v527_v10  ;;  %v453_v59 = vsub.f32 %v374_v0, %v439_v2  ;;  %v551_v0 = vld [vmem:[%s1125_s3 + $0x28] sm:$0xff]  ;;  %s651_s3 = sshll.u32 %s790_s2, 4  ;;  %s652_s3 = int_to_ptr.vmem [resolvable:$true] %s651_s3 }
 0x143   :  { %v377_v30 = vpop.f32.mrf.mxu0  ;;  %v574_v48 = vadd.f32 %v566_v28, %v558_v38  ;;  %v598_v49 = vsub.f32 %v582_v29, %v590_v39  ;;  %v559_v14 = vmul.f32 %v543_v3, %v453_v59  ;;  %v591_v15 = vmul.f32 %v551_v0, %v453_v59 }
 0x144   :  { %v609_v38 = vsel %vm317_vm1, %v571_v52, 0.0  ;;  %v625_v39 = vsel %vm317_vm1, %v595_v53, 0.0 }
 0x145   :  { %v605_v4 = vsel %vm317_vm1, %v574_v48, 0.0  ;;  %v627_v47 = vadd.f32 %v626_v36, %v625_v39 }
 0x146   :  { %v488_v18 = vpop.f32.mrf.mxu2  ;;  %v606_v22 = vadd.f32 %v605_v4, %v604_v12 }
 0x147   :  { %v530_v50 = vadd.f32 %v529_v5, %v488_v18  ;;  %v621_v5 = vsel %vm317_vm1, %v598_v49, 0.0  ;;  %v573_v18 = vadd.f32 %v565_v63, %v557_v56 }
 0x148   :  { %v442_v31 = vpop.f32.mrf.mxu1  ;;  %v622_v23 = vadd.f32 %v621_v5, %v620_v13 }
 0x149   :  { %v532_v40 = vpop.f32.mrf.mxu3  ;;  %v454_v54 = vsub.f32 %v377_v30, %v442_v31  ;;  %v567_v6 = vmul.f32 %v551_v0, %v530_v50  ;;  %v583_v7 = vmul.f32 %v543_v3, %v530_v50  ;;  %v610_v35 = vsel %vm317_vm1, %v573_v18, 0.0 }
 0x14a   :  { %v611_v46 = vadd.f32 %v610_v35, %v609_v38 }
 0x14b   :  { %v560_v8 = vmul.f32 %v544_v58, %v454_v54  ;;  %v592_v9 = vmul.f32 %v552_v60, %v454_v54  ;;  %v380_v16 = vpop.f32.mrf.mxu0  ;;  %v575_v24 = vadd.f32 %v567_v6, %v559_v14  ;;  %v599_v25 = vsub.f32 %v583_v7, %v591_v15 }
 0x14d   :  { %v628_v41 = vsel %vm317_vm1, %v599_v25, 0.0 }
 0x14e   :  { %v491_v61 = vpop.f32.mrf.mxu2  ;;  %v629_v51 = vadd.f32 %v628_v41, %v627_v47 }
 0x14f   :  { %v533_v2 = vadd.f32 %v532_v40, %v491_v61  ;;  %v612_v40 = vsel %vm317_vm1, %v575_v24, 0.0 }
 0x150   :  { %v445_v17 = vpop.f32.mrf.mxu1  ;;  %v613_v50 = vadd.f32 %v612_v40, %v611_v46 }
 0x151   :  { %v568_v10 = vmul.f32 %v552_v60, %v533_v2  ;;  %v584_v11 = vmul.f32 %v544_v58, %v533_v2  ;;  %v535_v26 = vpop.f32.mrf.mxu3  ;;  %v455_v29 = vsub.f32 %v380_v16, %v445_v17 }
 0x153   :  { %v576_v20 = vadd.f32 %v568_v10, %v560_v8  ;;  %v600_v21 = vsub.f32 %v584_v11, %v592_v9  ;;  %v561_v42 = vmul.f32 %v545_v32, %v455_v29  ;;  %v593_v43 = vmul.f32 %v553_v33, %v455_v29 }
 0x155   :  { %v607_v27 = vsel %vm317_vm1, %v576_v20, 0.0  ;;  %v623_v28 = vsel %vm317_vm1, %v600_v21, 0.0 }
 0x156   :  { %v608_v30 = vadd.f32 %v607_v27, %v606_v22  ;;  %v624_v31 = vadd.f32 %v623_v28, %v622_v23  ;;  %v494_v34 = vpop.f32.mrf.mxu2 }
 0x157   :  { %v536_v37 = vadd.f32 %v535_v26, %v494_v34 }
 0x158   :  { %632 = vst.msk [vmem:[#allocation4] sm:$0xff] %vm317_vm1, %v624_v31 }
 0x159   :  { %616 = vst.msk [vmem:[#allocation2] sm:$0xff] %vm317_vm1, %v608_v30  ;;  %v569_v44 = vmul.f32 %v553_v33, %v536_v37  ;;  %v585_v45 = vmul.f32 %v545_v32, %v536_v37 }
 0x15b   :  { %v577_v48 = vadd.f32 %v569_v44, %v561_v42  ;;  %v601_v49 = vsub.f32 %v585_v45, %v593_v43 }
 0x15d   :  { %v614_v52 = vsel %vm317_vm1, %v577_v48, 0.0  ;;  %v630_v53 = vsel %vm317_vm1, %v601_v49, 0.0 }
 0x15e   :  { %v615_v54 = vadd.f32 %v614_v52, %v613_v50  ;;  %v631_v55 = vadd.f32 %v630_v53, %v629_v51 }
 0x160   :  { %633 = vst.msk [vmem:[#allocation4 + $0x8] sm:$0xff] %vm317_vm1, %v631_v55 }
 0x161   :  { %617 = vst.msk [vmem:[#allocation2 + $0x8] sm:$0xff] %vm317_vm1, %v615_v54  ;;  %659 = dma.vmem_to_hbm [thread:$0]  %s652_s3, 256, %s654_s18, [#allocation5], %s792_s10, %s792_s10, %s793_s21  }
 0x162   :  { %646 = dma.vmem_to_hbm [thread:$0]  %s639_s20, 256, %s641_s1, [#allocation3], %s792_s10, %s792_s10, %s793_s21  }
 0x163   :  { %786 = dma.done.wait [#allocation3], 256  }
 0x164   :  { %787 = vsyncadd [#allocation3], 4294967040 }
 0x165   :  { %788 = dma.done.wait [#allocation5], 256  }
 0x166   :  { %789 = vsyncadd [#allocation5], 4294967040 }
 0x167   :  { %668 = vsyncpa [#allocation3], 1 }
 0x168   :  { %669 = vsyncpa [#allocation5], 1 }

</bundles_post_ra>
